<compile_context>
chip_gen: v6e
topology: v6e:2x2x1
jax: 0.10.0
libtpu: 0.0.40
codegen_flags: <defaults>
</compile_context>

<pallas_src>
import functools
import math
from typing import NamedTuple

import jax
import jax.numpy as jnp
from jax.experimental import pallas as pl
from jax.experimental.pallas import tpu as pltpu


def _round_up(x, m):
    return ((x + m - 1) // m) * m


def _pad_to(a, shape):
    pads = tuple((0, t - s) for s, t in zip(a.shape, shape))
    if all(p == (0, 0) for p in pads):
        return a
    return jnp.pad(a, pads)


def _vmem_capacity_bytes():
    try:
        return int(pltpu.get_tpu_info().vmem_capacity_bytes)
    except Exception:
        return 64 << 20   # conservative fallback (v7x per-TC VMEM)


def _default_act(y):
    # tanh-form gelu: exp/tanh lower to the EUP slot (free next to MXU work).
    return jax.nn.gelu(y, approximate=True)


class GLUParams(NamedTuple):
    """Pre-padded / pre-cast GLU parameters (built once at load time)."""
    w_in: jax.Array    # (Hp, 2*Ip) compute dtype, fused [W_y | W_z], zero padded
    b_in: jax.Array    # (1, 2*Ip)  float32,        fused [b_y | b_z], zero padded
    w_out: jax.Array   # (Ip, Hp)   compute dtype, zero padded
    b_out: jax.Array   # (1, Hp)    float32, zero padded
    hidden: int        # H (un-padded)
    inter: int         # I (un-padded)


def prepare_glu_params(w_in, b_in, w_out, b_out, *, compute_dtype=jnp.bfloat16):
    """One-time padding + casting of the weights (do NOT call per forward).

    w_in: [H, 2I] (x @ w_in layout), b_in: [2I], w_out: [I, H], b_out: [H].
    Biases stay float32 (they add into the f32 MXU accumulator).
    """
    H, two_i = w_in.shape
    I = two_i // 2
    assert w_in.shape == (H, 2 * I)
    assert w_out.shape == (I, H) and b_in.shape == (2 * I,) and b_out.shape == (H,)
    Hp = _round_up(H, 128)
    Ip = _round_up(I, 128)

    if Hp == H and Ip == I:
        w_in_p = w_in.astype(compute_dtype)
        b_in_p = b_in.reshape(1, 2 * I).astype(jnp.float32)
    else:
        # Keep the y/z split lane-aligned at column Ip.
        w_in_p = jnp.concatenate(
            [_pad_to(w_in[:, :I], (Hp, Ip)), _pad_to(w_in[:, I:], (Hp, Ip))],
            axis=-1).astype(compute_dtype)
        b_in_p = jnp.concatenate(
            [_pad_to(b_in[:I].reshape(1, I), (1, Ip)),
             _pad_to(b_in[I:].reshape(1, I), (1, Ip))],
            axis=-1).astype(jnp.float32)
    w_out_p = _pad_to(w_out, (Ip, Hp)).astype(compute_dtype)
    b_out_p = _pad_to(b_out.reshape(1, H), (1, Hp)).astype(jnp.float32)
    return GLUParams(w_in_p, b_in_p, w_out_p, b_out_p, H, I)


# --------------------------------------------------------------------------
# Kernel 1: weight-resident (small / medium H*I).  One wide in_proj matmul.
# --------------------------------------------------------------------------
def _glu_resident_kernel(x_ref, w_in_ref, b_in_ref, w_out_ref, b_out_ref,
                         o_ref, *, act):
    ip = w_out_ref.shape[0]
    # One wide MXU matmul covers both GLU branches; accumulate in f32.
    h = jnp.dot(x_ref[...], w_in_ref[...],
                preferred_element_type=jnp.float32) + b_in_ref[...]
    y = h[:, :ip]            # gate branch   (Ip multiple of 128 -> lane aligned)
    z = h[:, ip:]            # linear branch
    gated = act(y) * z
    out = jnp.dot(gated.astype(w_out_ref.dtype), w_out_ref[...],
                  preferred_element_type=jnp.float32) + b_out_ref[...]
    o_ref[...] = out.astype(o_ref.dtype)


# --------------------------------------------------------------------------
# Kernel 2: weight-streaming over I-chunks (large H*I, esp. v7x 64 MiB VMEM).
# --------------------------------------------------------------------------
def _glu_stream_kernel(x_ref, wy_ref, wz_ref, by_ref, bz_ref,
                       w_out_ref, b_out_ref, o_ref, acc_ref, *, act):
    j = pl.program_id(1)

    @pl.when(j == 0)
    def _():
        acc_ref[...] = jnp.zeros_like(acc_ref)

    # Full contraction over H for this I-chunk (both branches), f32 accumulate.
    y = jnp.dot(x_ref[...], wy_ref[...],
                preferred_element_type=jnp.float32) + by_ref[...]
    z = jnp.dot(x_ref[...], wz_ref[...],
                preferred_element_type=jnp.float32) + bz_ref[...]
    gated = act(y) * z
    acc_ref[...] += jnp.dot(gated.astype(w_out_ref.dtype), w_out_ref[...],
                            preferred_element_type=jnp.float32)

    @pl.when(j == pl.num_programs(1) - 1)
    def _():
        o_ref[...] = (acc_ref[...] + b_out_ref[...]).astype(o_ref.dtype)


def glu_forward(x, params: GLUParams, *, tm=128, ti=512, force_stream=False,
                act=_default_act):
    """GLU forward pass.  x: [..., H]; params from prepare_glu_params()."""
    H, I = params.hidden, params.inter
    Ip, Hp = params.w_out.shape
    assert x.shape[-1] == H
    assert tm % 16 == 0 and tm >= 16      # 16 keeps bf16 sublane packing legal
    out_dtype = x.dtype
    wdtype = params.w_in.dtype
    wsz = jnp.dtype(wdtype).itemsize
    osz = jnp.dtype(out_dtype).itemsize

    orig_shape = x.shape
    x2d = x.reshape(-1, H)
    M = x2d.shape[0]

    # Small-M adaptation: don't pad decode-style calls up to a 128-row tile.
    tm_eff = min(tm, _round_up(max(M, 1), 16))
    Mp = _round_up(max(M, 1), tm_eff)

    x_p = _pad_to(x2d, (Mp, Hp)).astype(wdtype)

    vmem_cap = _vmem_capacity_bytes()
    vmem_limit = int(vmem_cap * 0.9)      # leave headroom for compiler scratch

    # VMEM accounting for the resident path:
    #   weights/biases single-buffered (Buffered(1)), x/out tiles double-
    #   buffered, plus the f32 intermediates h / gated / out.
    resident = (Hp * 2 * Ip + Ip * Hp) * wsz + (2 * Ip + Hp) * 4
    tiles = 2 * tm_eff * Hp * (wsz + osz)
    interm = (tm_eff * 2 * Ip + tm_eff * Ip + tm_eff * Hp) * 4
    fits_resident = (resident + tiles + interm) <= int(vmem_cap * 0.75)

    cost = pl.CostEstimate(
        flops=6 * Mp * Hp * Ip,                 # 2*M*H*2I + 2*M*I*H
        transcendentals=Mp * Ip,                # one tanh per gate element
        bytes_accessed=(Mp * Hp * (wsz + osz)
                        + (Hp * 2 * Ip + Ip * Hp) * wsz
                        + (2 * Ip + Hp) * 4))

    grid_i = Mp // tm_eff

    if fits_resident and not force_stream:
        kernel = functools.partial(_glu_resident_kernel, act=act)
        out_p = pl.pallas_call(
            kernel,
            out_shape=jax.ShapeDtypeStruct((Mp, Hp), out_dtype),
            grid_spec=pltpu.PrefetchScalarGridSpec(
                num_scalar_prefetch=0,
                grid=(grid_i,),
                in_specs=[
                    pl.BlockSpec((tm_eff, Hp), lambda i: (i, 0)),      # x tile
                    pl.BlockSpec((Hp, 2 * Ip), lambda i: (0, 0),
                                 pipeline_mode=pl.Buffered(1)),        # W_in
                    pl.BlockSpec((1, 2 * Ip), lambda i: (0, 0),
                                 pipeline_mode=pl.Buffered(1)),        # b_in (f32)
                    pl.BlockSpec((Ip, Hp), lambda i: (0, 0),
                                 pipeline_mode=pl.Buffered(1)),        # W_out
                    pl.BlockSpec((1, Hp), lambda i: (0, 0),
                                 pipeline_mode=pl.Buffered(1)),        # b_out (f32)
                ],
                out_specs=pl.BlockSpec((tm_eff, Hp), lambda i: (i, 0)),
            ),
            compiler_params=pltpu.CompilerParams(
                dimension_semantics=("parallel",),
                vmem_limit_bytes=vmem_limit),
            cost_estimate=cost,
        )(x_p, params.w_in, params.b_in, params.w_out, params.b_out)
    else:
        # Weight-streaming path: grid = (row tiles, I-chunks); per chunk j we
        # DMA the y/z column blocks of W_in (same HBM array, two index_maps)
        # and the matching W_out row block; f32 accumulator in scratch.
        ti_eff = max(128, math.gcd(ti, Ip))   # Ip is a multiple of 128
        nj = Ip // ti_eff
        kernel = functools.partial(_glu_stream_kernel, act=act)
        out_p = pl.pallas_call(
            kernel,
            out_shape=jax.ShapeDtypeStruct((Mp, Hp), out_dtype),
            grid_spec=pltpu.PrefetchScalarGridSpec(
                num_scalar_prefetch=0,
                grid=(grid_i, nj),
                in_specs=[
                    pl.BlockSpec((tm_eff, Hp), lambda i, j: (i, 0)),       # x
                    pl.BlockSpec((Hp, ti_eff), lambda i, j: (0, j)),       # W_y chunk
                    pl.BlockSpec((Hp, ti_eff), lambda i, j: (0, j + nj)),  # W_z chunk
                    pl.BlockSpec((1, ti_eff), lambda i, j: (0, j)),        # b_y chunk
                    pl.BlockSpec((1, ti_eff), lambda i, j: (0, j + nj)),   # b_z chunk
                    pl.BlockSpec((ti_eff, Hp), lambda i, j: (j, 0)),       # W_out chunk
                    pl.BlockSpec((1, Hp), lambda i, j: (0, 0),
                                 pipeline_mode=pl.Buffered(1)),            # b_out
                ],
                out_specs=pl.BlockSpec((tm_eff, Hp), lambda i, j: (i, 0)),
                scratch_shapes=[pltpu.VMEM((tm_eff, Hp), jnp.float32)],
            ),
            compiler_params=pltpu.CompilerParams(
                dimension_semantics=("parallel", "arbitrary"),
                vmem_limit_bytes=vmem_limit),
            cost_estimate=cost,
        )(x_p, params.w_in, params.w_in, params.b_in, params.b_in,
          params.w_out, params.b_out)

    return out_p[:M, :H].reshape(orig_shape)


def _reference(x, w_in, b_in, w_out, b_out):
    I = w_in.shape[-1] // 2
    h = x @ w_in + b_in
    y, z = h[..., :I], h[..., I:]
    return (jax.nn.gelu(y, approximate=True) * z) @ w_out + b_out


if __name__ == "__main__":
    # Config: hidden_size=32, intermediate_size=64, batch=2, seq=8.
    B, S, H, I = 2, 8, 32, 64

    key = jax.random.PRNGKey(0)
    kx, k1, k2, k3, k4 = jax.random.split(key, 5)

    x = jax.random.normal(kx, (B, S, H), dtype=jnp.float32)
    # Deterministic synthetic parameters (stored [in, out] for x @ W).
    w_in = jax.random.normal(k1, (H, 2 * I), dtype=jnp.float32) * 0.05
    b_in = jax.random.normal(k2, (2 * I,), dtype=jnp.float32) * 0.05
    w_out = jax.random.normal(k3, (I, H), dtype=jnp.float32) * 0.05
    b_out = jax.random.normal(k4, (H,), dtype=jnp.float32) * 0.05

    # TODO(synk): config.hidden_act is unknown; tanh-approximate gelu assumed
    # here and matched in the reference — swap `act=` if the config differs.
    ref = _reference(x, w_in, b_in, w_out, b_out)

    # f32 operands (matches reference precision), weight-resident path.
    params_f32 = prepare_glu_params(w_in, b_in, w_out, b_out,
                                    compute_dtype=jnp.float32)
    out = glu_forward(x, params_f32)
    jax.block_until_ready(out)
    assert out.shape == (B, S, H)
    assert jnp.allclose(out, ref, atol=1e-3, rtol=1e-3), "f32 mismatch"

    # bf16 MXU operands (default; recommended on v5e/v6e/v7x), f32 accumulate.
    params_bf16 = prepare_glu_params(w_in, b_in, w_out, b_out)
    out_bf16 = glu_forward(x, params_bf16)
    jax.block_until_ready(out_bf16)
    assert jnp.allclose(out_bf16, ref, atol=5e-2, rtol=5e-2), "bf16 mismatch"

    # Weight-streaming path (used automatically for large H*I); exercise it.
    out_stream = glu_forward(x, params_f32, force_stream=True)
    jax.block_until_ready(out_stream)
    assert jnp.allclose(out_stream, ref, atol=1e-3, rtol=1e-3), "stream mismatch"

    print("KERNEL_OK")
</pallas_src>

<mosaic_0001>
module attributes {stable_mosaic.version = 11 : i64} {
  func.func @_glu_resident_kernel(%arg0: i32, %arg1: memref<16x128xf32, #tpu.memory_space<vmem>>, %arg2: memref<128x256xf32, #tpu.memory_space<vmem>>, %arg3: memref<1x256xf32, #tpu.memory_space<vmem>>, %arg4: memref<128x128xf32, #tpu.memory_space<vmem>>, %arg5: memref<1x128xf32, #tpu.memory_space<vmem>>, %arg6: memref<16x128xf32, #tpu.memory_space<vmem>>) attributes {dimension_semantics = [#tpu.dimension_semantics<parallel>], iteration_bounds = array<i64: 1>, scalar_prefetch = 0 : i64, scratch_operands = 0 : i64, tpu.core_type = #tpu.core_type<tc>, window_params = [{transform_indices = @transform_0, window_bounds = array<i64: 16, 128>}, {pipeline_mode = #tpu.pipeline_mode<synchronous>, transform_indices = @transform_1, window_bounds = array<i64: 128, 256>}, {pipeline_mode = #tpu.pipeline_mode<synchronous>, transform_indices = @transform_2, window_bounds = array<i64: 1, 256>}, {pipeline_mode = #tpu.pipeline_mode<synchronous>, transform_indices = @transform_3, window_bounds = array<i64: 128, 128>}, {pipeline_mode = #tpu.pipeline_mode<synchronous>, transform_indices = @transform_4, window_bounds = array<i64: 1, 128>}, {transform_indices = @transform_5, window_bounds = array<i64: 16, 128>}]} {
    %c0 = arith.constant 0 : index
    %c0_0 = arith.constant 0 : index
    %0 = vector.load %arg1[%c0, %c0_0] : memref<16x128xf32, #tpu.memory_space<vmem>>, vector<16x128xf32>
    %c0_1 = arith.constant 0 : index
    %c0_2 = arith.constant 0 : index
    %1 = vector.load %arg2[%c0_1, %c0_2] : memref<128x256xf32, #tpu.memory_space<vmem>>, vector<128x256xf32>
    %cst = arith.constant dense<0.000000e+00> : vector<16x256xf32>
    %2 = tpu.matmul %0, %1, %cst {dimension_numbers = #tpu.dot_dimension_numbers<[1], [0], [0], [1], [0, 0, 1, 1], [], []>} : vector<16x128xf32>, vector<128x256xf32>, vector<16x256xf32> -> vector<16x256xf32>
    %c0_3 = arith.constant 0 : index
    %c0_4 = arith.constant 0 : index
    %3 = vector.load %arg3[%c0_3, %c0_4] : memref<1x256xf32, #tpu.memory_space<vmem>>, vector<1x256xf32>
    %4 = vector.broadcast %3 : vector<1x256xf32> to vector<16x256xf32>
    %5 = arith.addf %2, %4 : vector<16x256xf32>
    %6 = vector.extract_strided_slice %5 {offsets = [0, 0], sizes = [16, 128], strides = [1, 1]} : vector<16x256xf32> to vector<16x128xf32>
    %7 = vector.extract_strided_slice %5 {offsets = [0, 128], sizes = [16, 128], strides = [1, 1]} : vector<16x256xf32> to vector<16x128xf32>
    %8 = arith.mulf %6, %6 : vector<16x128xf32>
    %9 = arith.mulf %6, %8 : vector<16x128xf32>
    %cst_5 = arith.constant 4.471500e-02 : f32
    %10 = vector.broadcast %cst_5 : f32 to vector<16x128xf32>
    %11 = arith.mulf %10, %9 : vector<16x128xf32>
    %12 = arith.addf %6, %11 : vector<16x128xf32>
    %cst_6 = arith.constant 0.797884583 : f32
    %13 = vector.broadcast %cst_6 : f32 to vector<16x128xf32>
    %14 = arith.mulf %13, %12 : vector<16x128xf32>
    %15 = math.tanh %14 : vector<16x128xf32>
    %cst_7 = arith.constant 1.000000e+00 : f32
    %16 = vector.broadcast %cst_7 : f32 to vector<16x128xf32>
    %17 = arith.addf %16, %15 : vector<16x128xf32>
    %cst_8 = arith.constant 5.000000e-01 : f32
    %18 = vector.broadcast %cst_8 : f32 to vector<16x128xf32>
    %19 = arith.mulf %18, %17 : vector<16x128xf32>
    %20 = arith.mulf %6, %19 : vector<16x128xf32>
    %21 = arith.mulf %20, %7 : vector<16x128xf32>
    %c0_9 = arith.constant 0 : index
    %c0_10 = arith.constant 0 : index
    %22 = vector.load %arg4[%c0_9, %c0_10] : memref<128x128xf32, #tpu.memory_space<vmem>>, vector<128x128xf32>
    %cst_11 = arith.constant dense<0.000000e+00> : vector<16x128xf32>
    %23 = tpu.matmul %21, %22, %cst_11 {dimension_numbers = #tpu.dot_dimension_numbers<[1], [0], [0], [1], [0, 0, 1, 1], [], []>} : vector<16x128xf32>, vector<128x128xf32>, vector<16x128xf32> -> vector<16x128xf32>
    %c0_12 = arith.constant 0 : index
    %c0_13 = arith.constant 0 : index
    %24 = vector.load %arg5[%c0_12, %c0_13] : memref<1x128xf32, #tpu.memory_space<vmem>>, vector<1x128xf32>
    %25 = vector.broadcast %24 : vector<1x128xf32> to vector<16x128xf32>
    %26 = arith.addf %23, %25 : vector<16x128xf32>
    %c0_14 = arith.constant 0 : index
    %c0_15 = arith.constant 0 : index
    %27 = vector.load %arg6[%c0_14, %c0_15] : memref<16x128xf32, #tpu.memory_space<vmem>>, vector<16x128xf32>
    tpu.vector_store %arg6[%c0_14, %c0_15], %26 {strides = array<i32>} : memref<16x128xf32, #tpu.memory_space<vmem>>, vector<16x128xf32>,
    return
  }
  func.func @transform_0(%arg0: i32) -> (i32, i32) {
    %c0_i32 = arith.constant 0 : i32
    %c0_i32_0 = arith.constant 0 : i32
    return %arg0, %c0_i32 : i32, i32
  }
  func.func @transform_1(%arg0: i32) -> (i32, i32) {
    %c0_i32 = arith.constant 0 : i32
    %c0_i32_0 = arith.constant 0 : i32
    %c0_i32_1 = arith.constant 0 : i32
    return %c0_i32, %c0_i32_0 : i32, i32
  }
  func.func @transform_2(%arg0: i32) -> (i32, i32) {
    %c0_i32 = arith.constant 0 : i32
    %c0_i32_0 = arith.constant 0 : i32
    %c0_i32_1 = arith.constant 0 : i32
    return %c0_i32, %c0_i32_0 : i32, i32
  }
  func.func @transform_3(%arg0: i32) -> (i32, i32) {
    %c0_i32 = arith.constant 0 : i32
    %c0_i32_0 = arith.constant 0 : i32
    %c0_i32_1 = arith.constant 0 : i32
    return %c0_i32, %c0_i32_0 : i32, i32
  }
  func.func @transform_4(%arg0: i32) -> (i32, i32) {
    %c0_i32 = arith.constant 0 : i32
    %c0_i32_0 = arith.constant 0 : i32
    %c0_i32_1 = arith.constant 0 : i32
    return %c0_i32, %c0_i32_0 : i32, i32
  }
  func.func @transform_5(%arg0: i32) -> (i32, i32) {
    %c0_i32 = arith.constant 0 : i32
    %c0_i32_0 = arith.constant 0 : i32
    return %arg0, %c0_i32 : i32, i32
  }
}

</mosaic_0001>

<bundles_post_ra>
// kernel: tpu_custom_call.1
= control target key start
LH: loop header
LB: loop body
LE: loop exit
PB: predicated region body
PF: predicated region fallthrough
CT: control target
= control target key end

     0   :  { %10 = vsyncpa [#allocation3], 0  ;;  %s544_s0 = inlined_call_operand.hbm [shape: f32[16,128], index: 0, kind: input, shape index: {}]   ;;  %s545_s1 = inlined_call_operand.hbm [shape: f32[128,256], index: 1, kind: input, shape index: {}]   ;;  %s546_s2 = inlined_call_operand.vmem [shape: f32[1,256], index: 2, kind: input, shape index: {}]   ;;  %s547_s3 = inlined_call_operand.hbm [shape: f32[128,128], index: 3, kind: input, shape index: {}]   ;;  %s548_s4 = inlined_call_operand.vmem [shape: f32[1,128], index: 4, kind: input, shape index: {}]   ;;  %s549_s5 = inlined_call_operand.hbm [shape: f32[16,128], index: 5, kind: output, shape index: {}]  }
   0x1   :  { %11 = vsyncpa [#allocation6], 0 }
   0x2   :  { %12 = vsyncpa [#allocation4], 0  ;;  %s476_s18 = smov [#allocation5]  }
   0x3   :  { %s30_s19 = sshll.u32 %s476_s18, 4  ;;  %s31_s19 = int_to_ptr.vmem [resolvable:$true] %s30_s19 }
   0x4   :  { %s398_s20 = scalar_lea.vmem %s31_s19, 4096  ;;  %p403_p1 = scmp.lt.s32.totalorder %s31_s19, %s31_s19 }
   0x5   :  { %p399_p0 = scmp.ne.s32.totalorder %s31_s19, %s398_s20  ;;  %p404_p2 = scmp.lt.s32.totalorder %s398_s20, %s398_s20 }
   0x7   :  { %p405_p3 = por %p404_p2, %p403_p1 }
   0x9   :  { %p406_p4 = pnand %p405_p3, %p399_p0 }
   0xb   :  { %409 = shalt.err (!%p406_p4)
}
   0xc   :  { %s477_s21 = smov 256   ;;  %s478_s22 = smov 16  }
   0xd   :  { %36 = dma.hbm_to_vmem [thread:$0]  %s545_s1, 4096, %s31_s19, [#allocation6], %s477_s21, %s477_s21, %s478_s22  }
   0xe   :  { %s479_s25 = smov [#allocation2]  }
   0xf   :  { %s18_s26 = sshll.u32 %s479_s25, 4  ;;  %s19_s26 = int_to_ptr.vmem [resolvable:$true] %s18_s26 }
  0x10   :  { %s418_s27 = scalar_lea.vmem %s19_s26, 256  ;;  %p423_p6 = scmp.lt.s32.totalorder %s19_s26, %s19_s26 }
  0x11   :  { %p419_p5 = scmp.ne.s32.totalorder %s19_s26, %s418_s27  ;;  %p424_p7 = scmp.lt.s32.totalorder %s418_s27, %s418_s27 }
  0x13   :  { %p425_p8 = por %p424_p7, %p423_p6 }
  0x15   :  { %p426_p9 = pnand %p425_p8, %p419_p5 }
  0x17   :  { %429 = shalt.err (!%p426_p9)
}
  0x18   :  { %s480_s28 = smov 128   ;;  %s481_s29 = smov 8  }
  0x19   :  { %24 = dma.hbm_to_vmem [thread:$0]  %s544_s0, 256, %s19_s26, [#allocation3], %s480_s28, %s480_s28, %s481_s29  }
  0x1a   :  { %s482_s1 = smov [#allocation7]  }
  0x1b   :  { %s44_s7 = sshll.u32 %s482_s1, 4  ;;  %s45_s7 = int_to_ptr.vmem [resolvable:$true] %s44_s7 }
  0x1c   :  { %s438_s8 = scalar_lea.vmem %s45_s7, 2048  ;;  %p443_p11 = scmp.lt.s32.totalorder %s45_s7, %s45_s7 }
  0x1d   :  { %p439_p10 = scmp.ne.s32.totalorder %s45_s7, %s438_s8  ;;  %p444_p12 = scmp.lt.s32.totalorder %s438_s8, %s438_s8 }
  0x1f   :  { %p445_p13 = por %p444_p12, %p443_p11 }
  0x21   :  { %p446_p0 = pnand %p445_p13, %p439_p10 }
  0x23   :  { %449 = shalt.err (!%p446_p0)
}
  0x24   :  { %50 = dma.hbm_to_vmem [thread:$0]  %s547_s3, 2048, %s45_s7, [#allocation6], %s480_s28, %s480_s28, %s481_s29  }
  0x25   :  { %470 = dma.done.wait [#allocation3], 256  }
  0x26   :  { %471 = vsyncadd [#allocation3], 4294967040 }
  0x27   :  { %472 = dma.done.wait [#allocation6], 6144  }
  0x28   :  { %473 = vsyncadd [#allocation6], 4294961152  ;;  %v483_v0 = vmov 0.0   ;;  %v95_v1 = vld [vmem:[#allocation5 + $0xf8] sm:$0xff]  ;;  %v94_v2 = vld [vmem:[#allocation5 + $0xf0] sm:$0xff]  ;;  %v98_v51 = vlaneseq  ;;  %s484_s12 = smov [#allocation8]  }
  0x29   :  { %172 = vmatprep.mubr.f32.mxu0 %v483_v0  ;;  %v93_v3 = vld [vmem:[#allocation5 + $0xe8] sm:$0xff]  ;;  %108 = vmatprep.subr.mxu0 %v95_v1  ;;  %v92_v4 = vld [vmem:[#allocation5 + $0xe0] sm:$0xff]  ;;  %v91_v5 = vld [vmem:[#allocation5 + $0xd8] sm:$0xff]  ;;  %s310_s13 = sshll.u32 %s484_s12, 4  ;;  %s311_s13 = int_to_ptr.vmem [resolvable:$true] %s310_s13 }
  0x2a   :  { %109 = vmatpush1.msra.mxu0 %v94_v2  ;;  %v90_v6 = vld [vmem:[#allocation5 + $0xd0] sm:$0xff]  ;;  %v89_v7 = vld [vmem:[#allocation5 + $0xc8] sm:$0xff]  ;;  %v88_v8 = vld [vmem:[#allocation5 + $0xc0] sm:$0xff]  ;;  %v99_v52 = vshrl.u32 %v98_v51, 7  ;;  %s450_s14 = scalar_lea.vmem %s311_s13, 256  ;;  %p455_p2 = scmp.lt.s32.totalorder %s311_s13, %s311_s13 }
  0x2b   :  { %110 = vmatprep.subr.mxu0 %v93_v3  ;;  %v87_v9 = vld [vmem:[#allocation5 + $0xb8] sm:$0xff]  ;;  %v86_v10 = vld [vmem:[#allocation5 + $0xb0] sm:$0xff]  ;;  %v85_v11 = vld [vmem:[#allocation5 + $0xa8] sm:$0xff]  ;;  %p451_p1 = scmp.ne.s32.totalorder %s311_s13, %s450_s14  ;;  %p456_p3 = scmp.lt.s32.totalorder %s450_s14, %s450_s14 }
  0x2c   :  { %111 = vmatpush1.msra.mxu0 %v92_v4  ;;  %v84_v12 = vld [vmem:[#allocation5 + $0xa0] sm:$0xff]  ;;  %v83_v13 = vld [vmem:[#allocation5 + $0x98] sm:$0xff]  ;;  %v82_v14 = vld [vmem:[#allocation5 + $0x90] sm:$0xff]  ;;  %v100_v53 = vsub.s32 0, %v99_v52 }
  0x2d   :  { %112 = vmatprep.subr.mxu0 %v91_v5  ;;  %v81_v15 = vld [vmem:[#allocation5 + $0x88] sm:$0xff]  ;;  %v80_v16 = vld [vmem:[#allocation5 + $0x80] sm:$0xff]  ;;  %v79_v17 = vld [vmem:[#allocation5 + $0x78] sm:$0xff]  ;;  %p457_p4 = por %p456_p3, %p455_p2 }
  0x2e   :  { %113 = vmatpush1.msra.mxu0 %v90_v6  ;;  %v78_v18 = vld [vmem:[#allocation5 + $0x70] sm:$0xff]  ;;  %v77_v19 = vld [vmem:[#allocation5 + $0x68] sm:$0xff]  ;;  %v76_v20 = vld [vmem:[#allocation5 + $0x60] sm:$0xff] }
  0x2f   :  { %114 = vmatprep.subr.mxu0 %v89_v7  ;;  %v75_v21 = vld [vmem:[#allocation5 + $0x58] sm:$0xff]  ;;  %v74_v22 = vld [vmem:[#allocation5 + $0x50] sm:$0xff]  ;;  %v73_v23 = vld [vmem:[#allocation5 + $0x48] sm:$0xff]  ;;  %v104_v7 = vsub.s32 1, %v99_v52  ;;  %p458_p5 = pnand %p457_p4, %p451_p1 }
  0x30   :  { %115 = vmatpush1.msra.mxu0 %v88_v8  ;;  %v72_v24 = vld [vmem:[#allocation5 + $0x40] sm:$0xff]  ;;  %v71_v25 = vld [vmem:[#allocation5 + $0x38] sm:$0xff]  ;;  %v70_v26 = vld [vmem:[#allocation5 + $0x30] sm:$0xff] }
  0x31   :  { %116 = vmatprep.subr.mxu0 %v87_v9  ;;  %v69_v27 = vld [vmem:[#allocation5 + $0x28] sm:$0xff]  ;;  %v68_v28 = vld [vmem:[#allocation5 + $0x20] sm:$0xff]  ;;  %v67_v29 = vld [vmem:[#allocation5 + $0x18] sm:$0xff] }
  0x32   :  { %117 = vmatpush1.msra.mxu0 %v86_v10  ;;  %v66_v30 = vld [vmem:[#allocation5 + $0x10] sm:$0xff]  ;;  %v65_v31 = vld [vmem:[#allocation5 + $0x8] sm:$0xff]  ;;  %v64_v32 = vld [vmem:[#allocation5] sm:$0xff] }
  0x33   :  { %118 = vmatprep.subr.mxu0 %v85_v11  ;;  %v62_v33 = vld [vmem:[#allocation2] sm:$0xff]  ;;  %v63_v34 = vld [vmem:[#allocation2 + $0x8] sm:$0xff]  ;;  %v218_v37 = vld [vmem:[#allocation7 + $0x68] sm:$0xff] }
  0x34   :  { %119 = vmatpush1.msra.mxu0 %v84_v12  ;;  %v220_v35 = vld [vmem:[#allocation7 + $0x78] sm:$0xff]  ;;  %v219_v36 = vld [vmem:[#allocation7 + $0x70] sm:$0xff]  ;;  %v217_v38 = vld [vmem:[#allocation7 + $0x60] sm:$0xff] }
  0x35   :  { %120 = vmatprep.subr.mxu0 %v83_v13  ;;  %342 = vmatprep.subr.mxu1 %v220_v35  ;;  %v216_v39 = vld [vmem:[#allocation7 + $0x58] sm:$0xff]  ;;  %v215_v40 = vld [vmem:[#allocation7 + $0x50] sm:$0xff]  ;;  %v214_v41 = vld [vmem:[#allocation7 + $0x48] sm:$0xff] }
  0x36   :  { %121 = vmatpush1.msra.mxu0 %v82_v14  ;;  %343 = vmatpush3.msra.mxu1 %v220_v35  ;;  %v213_v42 = vld [vmem:[#allocation7 + $0x40] sm:$0xff]  ;;  %v212_v43 = vld [vmem:[#allocation7 + $0x38] sm:$0xff]  ;;  %v211_v44 = vld [vmem:[#allocation7 + $0x30] sm:$0xff] }
  0x37   :  { %122 = vmatprep.subr.mxu0 %v81_v15  ;;  %344 = vmatprep.subr.mxu1 %v219_v36  ;;  %v210_v45 = vld [vmem:[#allocation7 + $0x28] sm:$0xff]  ;;  %v209_v46 = vld [vmem:[#allocation7 + $0x20] sm:$0xff]  ;;  %v208_v47 = vld [vmem:[#allocation7 + $0x18] sm:$0xff] }
  0x38   :  { %123 = vmatpush1.msra.mxu0 %v80_v16  ;;  %345 = vmatpush3.msra.mxu1 %v219_v36  ;;  %v207_v48 = vld [vmem:[#allocation7 + $0x10] sm:$0xff]  ;;  %v206_v49 = vld [vmem:[#allocation7 + $0x8] sm:$0xff]  ;;  %v205_v50 = vld [vmem:[#allocation7] sm:$0xff] }
  0x39   :  { %124 = vmatprep.subr.mxu0 %v79_v17  ;;  %346 = vmatprep.subr.mxu1 %v218_v37  ;;  %v96_v54 = vld [vmem:[%s546_s2] sm:$0x3] }
  0x3a   :  { %125 = vmatpush1.msra.mxu0 %v78_v18  ;;  %347 = vmatpush3.msra.mxu1 %v218_v37  ;;  %v101_v55 = vrot.slane %v96_v54, %v100_v53  ;;  %v105_v9 = vrot.slane %v96_v54, %v104_v7 }
  0x3b   :  { %126 = vmatprep.subr.mxu0 %v77_v19  ;;  %348 = vmatprep.subr.mxu1 %v217_v38 }
  0x3c   :  { %127 = vmatpush1.msra.mxu0 %v76_v20  ;;  %349 = vmatpush3.msra.mxu1 %v217_v38 }
  0x3d   :  { %128 = vmatprep.subr.mxu0 %v75_v21  ;;  %350 = vmatprep.subr.mxu1 %v216_v39 }
  0x3e   :  { %129 = vmatpush1.msra.mxu0 %v74_v22  ;;  %351 = vmatpush3.msra.mxu1 %v216_v39  ;;  %v323_v22 = vld [vmem:[%s548_s4] ss:$0 sm:$0xff] }
  0x3f   :  { %130 = vmatprep.subr.mxu0 %v73_v23  ;;  %352 = vmatprep.subr.mxu1 %v215_v40 }
  0x40   :  { %131 = vmatpush1.msra.mxu0 %v72_v24  ;;  %353 = vmatpush3.msra.mxu1 %v215_v40 }
  0x41   :  { %132 = vmatprep.subr.mxu0 %v71_v25  ;;  %354 = vmatprep.subr.mxu1 %v214_v41 }
  0x42   :  { %133 = vmatpush1.msra.mxu0 %v70_v26  ;;  %355 = vmatpush3.msra.mxu1 %v214_v41 }
  0x43   :  { %134 = vmatprep.subr.mxu0 %v69_v27  ;;  %356 = vmatprep.subr.mxu1 %v213_v42 }
  0x44   :  { %135 = vmatpush1.msra.mxu0 %v68_v28  ;;  %357 = vmatpush3.msra.mxu1 %v213_v42 }
  0x45   :  { %136 = vmatprep.subr.mxu0 %v67_v29  ;;  %358 = vmatprep.subr.mxu1 %v212_v43 }
  0x46   :  { %137 = vmatpush1.msra.mxu0 %v66_v30  ;;  %359 = vmatpush3.msra.mxu1 %v212_v43 }
  0x47   :  { %138 = vmatprep.subr.mxu0 %v65_v31  ;;  %360 = vmatprep.subr.mxu1 %v211_v44 }
  0x48   :  { %139 = vmatpush1.msra.mxu0 %v64_v32  ;;  %361 = vmatpush3.msra.mxu1 %v211_v44 }
  0x49   :  { %173 = vmatmul.mubr.f32.vlgmr.msra.gmra.mxu0 %v62_v33  ;;  %362 = vmatprep.subr.mxu1 %v210_v45 }
  0x4a   :  { %178 = vmatprep.mubr.f32.mxu0 %v483_v0  ;;  %363 = vmatpush3.msra.mxu1 %v210_v45 }
  0x4b   :  { %364 = vmatprep.subr.mxu1 %v209_v46 }
  0x4c   :  { %365 = vmatpush3.msra.mxu1 %v209_v46 }
  0x4d   :  { %179 = vmatmul.mubr.f32.gmra.mxu0 %v63_v34  ;;  %366 = vmatprep.subr.mxu1 %v208_v47 }
  0x4e   :  { %367 = vmatpush3.msra.mxu1 %v208_v47 }
  0x4f   :  { %368 = vmatprep.subr.mxu1 %v207_v48 }
  0x50   :  { %369 = vmatpush3.msra.mxu1 %v207_v48 }
  0x51   :  { %370 = vmatprep.subr.mxu1 %v206_v49 }
  0x52   :  { %371 = vmatpush3.msra.mxu1 %v206_v49 }
  0x53   :  { %372 = vmatprep.subr.mxu1 %v205_v50 }
  0x54   :  { %373 = vmatpush3.msra.mxu1 %v205_v50 }
 0x109   :  { %v174_v56 = vpop.f32.mrf.mxu0 }
 0x10a   :  { %v175_v57 = vadd.f32 %v174_v56, %v101_v55 }
 0x10b   :  { %v176_v58 = vpop.f32.mrf.mxu0 }
 0x10c   :  { %v185_v59 = vmul.f32 %v175_v57, %v175_v57  ;;  %v177_v13 = vadd.f32 %v176_v58, %v105_v9 }
 0x10d   :  { %v180_v60 = vpop.f32.mrf.mxu0 }
 0x10e   :  { %v187_v61 = vmul.f32 %v185_v59, %v175_v57  ;;  %v181_v62 = vadd.f32 %v180_v60, %v101_v55 }
 0x10f   :  { %v182_v16 = vpop.f32.mrf.mxu0 }
 0x110   :  { %v189_v63 = vmul.f32 0.044715, %v187_v61  ;;  %v186_v0 = vmul.f32 %v181_v62, %v181_v62  ;;  %v183_v19 = vadd.f32 %v182_v16, %v105_v9 }
 0x112   :  { %v191_v1 = vadd.f32 %v189_v63, %v175_v57  ;;  %v188_v2 = vmul.f32 %v186_v0, %v181_v62 }
 0x114   :  { %v190_v3 = vmul.f32 0.044715, %v188_v2  ;;  %v193_v4 = vmul.f32 0.7978846, %v191_v1 }
 0x116   :  { %v192_v5 = vadd.f32 %v190_v3, %v181_v62  ;;  %386 = vtanh.f32 %v193_v4 }
 0x118   :  { %v194_v6 = vmul.f32 0.7978846, %v192_v5 }
 0x11a   :  { %388 = vtanh.f32 %v194_v6 }
 0x123   :  { %v387_v8 = vpop.eup %386 }
 0x124   :  { %v197_v10 = vadd.f32 1.0, %v387_v8 }
 0x126   :  { %v199_v11 = vmul.f32 0.5, %v197_v10 }
 0x127   :  { %v389_v12 = vpop.eup %388 }
 0x128   :  { %v198_v14 = vadd.f32 1.0, %v389_v12  ;;  %v201_v15 = vmul.f32 %v199_v11, %v175_v57 }
 0x12a   :  { %v200_v17 = vmul.f32 0.5, %v198_v14  ;;  %v203_v18 = vmul.f32 %v201_v15, %v177_v13 }
 0x12c   :  { %v202_v20 = vmul.f32 %v200_v17, %v181_v62  ;;  %374 = vmatprep.mubr.f32.mxu1 %v203_v18 }
 0x12e   :  { %v204_v21 = vmul.f32 %v202_v20, %v183_v19 }
 0x130   :  { %375 = vmatmul.mubr.f32.vlgmr.msra.gmra.mxu1 %v204_v21 }
 0x1f0   :  { %v376_v23 = vpop.f32.mrf.mxu1 }
 0x1f1   :  { %v300_v24 = vadd.f32 %v376_v23, %v323_v22 }
 0x1f2   :  { %v294_v25 = vpop.f32.mrf.mxu1 }
 0x1f3   :  { %304 = vst [vmem:[#allocation8 + $0x8] sm:$0xff] %v300_v24  ;;  %v295_v26 = vadd.f32 %v323_v22, %v294_v25 }
 0x1f5   :  { %303 = vst [vmem:[#allocation8] sm:$0xff] %v295_v26 }
 0x1f6   :  { %461 = shalt.err (!%p458_p5)
}
 0x1f7   :  { %316 = dma.vmem_to_hbm [thread:$0]  %s311_s13, 256, %s549_s5, [#allocation4], %s480_s28, %s480_s28, %s481_s29  }
 0x1f8   :  { %474 = dma.done.wait [#allocation4], 256  }
 0x1f9   :  { %475 = vsyncadd [#allocation4], 4294967040 }
 0x1fa   :  { %320 = vsyncpa [#allocation3], 1 }
 0x1fb   :  { %321 = vsyncpa [#allocation6], 1 }
 0x1fc   :  { %322 = vsyncpa [#allocation4], 1 }

</bundles_post_ra>
